<compile_context>
chip_gen: v7x
topology: tpu7x:2x2x1
jax: 0.10.0
libtpu: 0.0.40
codegen_flags: <defaults>
</compile_context>

<pallas_src>
import functools as ft

import jax
import jax.numpy as jnp
from jax.experimental import pallas as pl
from jax.experimental.pallas import tpu as pltpu


# ----------------------------------------------------------------------------- helpers
def _cdiv(a: int, b: int) -> int:
    return -(-a // b)


def _round_up(x: int, m: int) -> int:
    return ((x + m - 1) // m) * m


def _vmem_capacity_bytes() -> int:
    """Physical VMEM per TensorCore; conservative fallback if the query fails."""
    try:
        cap = getattr(pltpu.get_tpu_info(), "vmem_capacity_bytes", None)
        if cap:
            return int(cap)
    except Exception:
        pass
    return 64 * 1024 * 1024  # v7x per-core VMEM (smallest of v5e / v6e / v7x)


def _choose_row_tile(M: int, E: int, F: int, n_out: int, heads_cols: int):
    """Pick the row tile so the double-buffered working set fits a VMEM budget."""
    M8 = _round_up(M, 8)
    cap = _vmem_capacity_bytes()
    budget = (cap * 3) // 4                        # headroom for compiler scratch
    heads_bytes = 2 * E * heads_cols * 2           # bf16 heads, double-buffered
    per_row = 2 * E * 4 + n_out * 2 * F * 4        # dbl-buffered f32 logit + outputs
    avail = max(budget - heads_bytes - (2 << 20), 8 * per_row)
    tm = min(1024, avail // per_row, M8)
    if tm >= 256:
        tm = (tm // 256) * 256                     # MXU row granule (v6e/v7x)
    else:
        tm = max(8, (tm // 8) * 8)                 # sublane granule
    # Keep >= 2 grid steps when there is enough work so v7x's two TensorCores
    # both get a share of the ("parallel",) row axis.
    if M8 > 256 and _cdiv(M, tm) < 2:
        tm = max(8, _round_up(_cdiv(M8, 2), 8))
    usage = heads_bytes + per_row * tm
    vmem_limit = int(min(cap, max(usage + (16 << 20), 32 << 20)))
    return tm, vmem_limit
    # TODO(synk): for very large embed_dim where tm drops below ~256, add a K
    # grid axis ("arbitrary", last) with an f32 VMEM accumulator instead of
    # shrinking the row tile further.


# ----------------------------------------------------------------------------- kernels
def _softmax_store(scores, out_ref, spins, occ):
    """Per-spin softmax over each occupation segment of the lane axis.

    Uses static slices (lane-tile aligned for the default occ=128, so they are
    zero-cost views); the Python loop over `spins` (2) is fully unrolled.
    """
    for s in range(spins):
        seg = scores[:, s * occ:(s + 1) * occ]
        m = jnp.max(seg, axis=-1, keepdims=True)
        e = jnp.exp(seg - m)
        denom = jnp.sum(e, axis=-1, keepdims=True)
        out_ref[:, s * occ:(s + 1) * occ] = (
            e * pl.reciprocal(denom, approx=True)).astype(out_ref.dtype)


def _prob_kernel(logit_ref, head_ref, prob_ref, *, spins, occ):
    x = logit_ref[...].astype(jnp.bfloat16)                        # (tm, E)
    scores = jnp.dot(x, head_ref[...], preferred_element_type=jnp.float32)
    _softmax_store(scores, prob_ref, spins, occ)


def _prob_phase_kernel(logit_ref, heads_ref, prob_ref, phase_ref, *, spins, occ, flat):
    x = logit_ref[...].astype(jnp.bfloat16)                        # (tm, E)
    # single fused matmul against the concatenated (E, 2F) head
    y = jnp.dot(x, heads_ref[...], preferred_element_type=jnp.float32)  # (tm, 2F)
    _softmax_store(y[:, :flat], prob_ref, spins, occ)
    phase_ref[...] = (jnp.tanh(y[:, flat:]) * jnp.pi).astype(phase_ref.dtype)


# ----------------------------------------------------------------------------- module
class HubbardDeembedding:
    """JAX/Pallas port of the PyTorch HubbardDeembedding module."""

    def __init__(self, embed_dim: int, target_token_dims=(2, 128), key=None):
        self.embed_dim = embed_dim
        self.target_token_dims = tuple(target_token_dims)
        self.target_flat_dim = ft.reduce(lambda a, b: a * b, self.target_token_dims)
        if key is None:
            key = jax.random.PRNGKey(0)
        k1, k2 = jax.random.split(key)
        # deterministic synthetic weights (stand-in for torch.randn parameters)
        self.prob_head = jax.random.normal(k1, (embed_dim, self.target_flat_dim), jnp.float32)
        self.phase_head = jax.random.normal(k2, (embed_dim, self.target_flat_dim), jnp.float32)
        # bf16 copies for the MXU; fused (E, 2F) so the phase path is ONE matmul
        self._prob_head_bf16 = self.prob_head.astype(jnp.bfloat16)
        self._phase_head_bf16 = self.phase_head.astype(jnp.bfloat16)
        self._fused_heads_bf16 = jnp.concatenate(
            [self._prob_head_bf16, self._phase_head_bf16], axis=1)

    def compute_psi(self, probs, phases):
        return probs * jnp.exp(1j * phases)

    def _run_kernel(self, logit2d, calculate_phase):
        M, E = logit2d.shape
        F = self.target_flat_dim
        occ = self.target_token_dims[-1]          # softmax axis (lane segments)
        spins = F // occ
        # NOTE: occ % 128 == 0 (default occ=128) keeps all slices lane-tile
        # aligned; other values stay correct but cost in-kernel relayouts.

        n_out = 2 if calculate_phase else 1
        heads_cols = 2 * F if calculate_phase else F
        tm, vmem_limit = _choose_row_tile(M, E, F, n_out, heads_cols)
        grid_m = _cdiv(M, tm)                      # ragged tail handled by masked stores

        logit_spec = pl.BlockSpec((tm, E), lambda i: (i, 0))
        out_spec = pl.BlockSpec((tm, F), lambda i: (i, 0))
        cparams = pltpu.CompilerParams(
            dimension_semantics=("parallel",),
            vmem_limit_bytes=vmem_limit)

        if calculate_phase:
            # TODO(synk): single-buffer the constant heads block (Buffered(1) /
            # manual VMEM staging) once it composes cleanly with megacore grids.
            heads_spec = pl.BlockSpec((E, 2 * F), lambda i: (0, 0))
            kern = ft.partial(_prob_phase_kernel, spins=spins, occ=occ, flat=F)
            prob, phase = pl.pallas_call(
                kern,
                out_shape=(jax.ShapeDtypeStruct((M, F), jnp.float32),
                           jax.ShapeDtypeStruct((M, F), jnp.float32)),
                grid_spec=pltpu.PrefetchScalarGridSpec(
                    num_scalar_prefetch=0, grid=(grid_m,),
                    in_specs=[logit_spec, heads_spec],
                    out_specs=[out_spec, out_spec]),
                compiler_params=cparams,
            )(logit2d, self._fused_heads_bf16)
            return prob, phase
        else:
            head_spec = pl.BlockSpec((E, F), lambda i: (0, 0))
            kern = ft.partial(_prob_kernel, spins=spins, occ=occ)
            prob = pl.pallas_call(
                kern,
                out_shape=jax.ShapeDtypeStruct((M, F), jnp.float32),
                grid_spec=pltpu.PrefetchScalarGridSpec(
                    num_scalar_prefetch=0, grid=(grid_m,),
                    in_specs=[logit_spec, head_spec],
                    out_specs=out_spec),
                compiler_params=cparams,
            )(logit2d, self._prob_head_bf16)
            return prob, None

    def __call__(self, logit, calculate_phase: bool = False):
        single = False
        if logit.ndim == 2:
            single = True
            logit = logit[None, ...]
        elif logit.ndim != 3:
            raise ValueError("logit must have shape (batch, embed) or (seq, batch, embed)")

        seq, batch, embed = logit.shape
        assert embed == self.embed_dim
        logit2d = logit.reshape(seq * batch, embed)

        prob2d, phase2d = self._run_kernel(logit2d, calculate_phase)
        prob = prob2d.reshape(seq, batch, *self.target_token_dims)
        if calculate_phase:
            phase = phase2d.reshape(seq, batch, *self.target_token_dims)
            return (prob[0], phase[0]) if single else (prob, phase)
        return prob[0] if single else prob


# ----------------------------------------------------------------------------- reference
def _reference(logit, prob_head, phase_head, target_token_dims, calculate_phase,
               matmul_dtype=jnp.float32):
    """Pure-JAX reference matching the PyTorch forward.

    matmul_dtype=jnp.bfloat16 emulates the kernel's bf16 MXU path (f32 accumulate).
    """
    single = logit.ndim == 2
    if single:
        logit = logit[None]
    seq, batch, _ = logit.shape
    lg = logit.astype(matmul_dtype)
    prob = jnp.einsum('ef,sbe->sbf', prob_head.astype(matmul_dtype), lg,
                      preferred_element_type=jnp.float32)
    prob = prob.reshape(seq, batch, *target_token_dims)
    prob = jax.nn.softmax(prob, axis=-1)
    if calculate_phase:
        phase = jnp.einsum('ef,sbe->sbf', phase_head.astype(matmul_dtype), lg,
                           preferred_element_type=jnp.float32)
        phase = phase.reshape(seq, batch, *target_token_dims)
        phase = jnp.tanh(phase) * jnp.pi
        return (prob[0], phase[0]) if single else (prob, phase)
    return prob[0] if single else prob


# ----------------------------------------------------------------------------- demo / check
if __name__ == "__main__":
    key = jax.random.PRNGKey(0)
    k_param, k_x = jax.random.split(key)

    seq, batch, embed = 8, 2, 32
    module = HubbardDeembedding(embed_dim=embed, target_token_dims=(2, 128), key=k_param)
    logit = jax.random.normal(k_x, (seq, batch, embed), jnp.float32)

    # ---- prob-only path, 3-D input (M = 16 rows, tile-aligned) ----
    prob = module(logit, calculate_phase=False)
    jax.block_until_ready(prob)
    assert prob.shape == (seq, batch, 2, 128)
    prob_bf = _reference(logit, module.prob_head, module.phase_head,
                         module.target_token_dims, False, matmul_dtype=jnp.bfloat16)
    # approx reciprocal in the softmax denominator -> slightly relaxed tolerance
    assert jnp.allclose(prob, prob_bf, atol=2e-3, rtol=2e-3)
    # per-spin probabilities normalized (up to approx-reciprocal slack)
    assert jnp.allclose(jnp.sum(prob, axis=-1), 1.0, atol=5e-3)
    # loose check against exact f32 torch semantics (bf16 MXU quantization)
    prob_f32 = _reference(logit, module.prob_head, module.phase_head,
                          module.target_token_dims, False, matmul_dtype=jnp.float32)
    assert jnp.allclose(prob, prob_f32, atol=5e-2, rtol=5e-2)

    # ---- prob + phase path, 2-D "single" input (M = 2: exercises the ragged
    #      trailing block handled by masked boundary stores, no padding pass) ----
    logit2d = logit[0]
    prob_s, phase_s = module(logit2d, calculate_phase=True)
    jax.block_until_ready((prob_s, phase_s))
    assert prob_s.shape == (batch, 2, 128) and phase_s.shape == (batch, 2, 128)
    prob_s_ref, phase_s_ref = _reference(logit2d, module.prob_head, module.phase_head,
                                         module.target_token_dims, True,
                                         matmul_dtype=jnp.bfloat16)
    assert jnp.allclose(prob_s, prob_s_ref, atol=2e-3, rtol=2e-3)
    assert jnp.allclose(phase_s, phase_s_ref, atol=1e-3, rtol=1e-3)
    assert bool(jnp.all(jnp.isfinite(phase_s)))

    print("KERNEL_OK")
</pallas_src>

<mosaic_0001>
module attributes {stable_mosaic.version = 11 : i64} {
  func.func @_prob_kernel(%arg0: i32, %arg1: memref<16x32xf32, #tpu.memory_space<vmem>>, %arg2: memref<32x256xbf16, #tpu.memory_space<vmem>>, %arg3: memref<16x256xf32, #tpu.memory_space<vmem>>) attributes {dimension_semantics = [#tpu.dimension_semantics<parallel>], iteration_bounds = array<i64: 1>, scalar_prefetch = 0 : i64, scratch_operands = 0 : i64, tpu.core_type = #tpu.core_type<tc>, window_params = [{transform_indices = @transform_0, window_bounds = array<i64: 16, 32>}, {pipeline_mode = #tpu.pipeline_mode<synchronous>, transform_indices = @transform_1, window_bounds = array<i64: 32, 256>}, {transform_indices = @transform_2, window_bounds = array<i64: 16, 256>}]} {
    %c0 = arith.constant 0 : index
    %c0_0 = arith.constant 0 : index
    %0 = vector.load %arg1[%c0, %c0_0] : memref<16x32xf32, #tpu.memory_space<vmem>>, vector<16x32xf32>
    %1 = arith.truncf %0 : vector<16x32xf32> to vector<16x32xbf16>
    %c0_1 = arith.constant 0 : index
    %c0_2 = arith.constant 0 : index
    %2 = vector.load %arg2[%c0_1, %c0_2] : memref<32x256xbf16, #tpu.memory_space<vmem>>, vector<32x256xbf16>
    %cst = arith.constant dense<0.000000e+00> : vector<16x256xf32>
    %3 = tpu.matmul %1, %2, %cst {dimension_numbers = #tpu.dot_dimension_numbers<[1], [0], [0], [1], [0, 0, 1, 1], [], []>} : vector<16x32xbf16>, vector<32x256xbf16>, vector<16x256xf32> -> vector<16x256xf32>
    %4 = vector.extract_strided_slice %3 {offsets = [0, 0], sizes = [16, 128], strides = [1, 1]} : vector<16x256xf32> to vector<16x128xf32>
    %cst_3 = arith.constant dense<0xFF800000> : vector<16xf32>
    %5 = vector.multi_reduction <maximumf>, %4, %cst_3 [1] : vector<16x128xf32> to vector<16xf32>
    %6 = vector.shape_cast %5 : vector<16xf32> to vector<16x1xf32>
    %7 = vector.broadcast %6 : vector<16x1xf32> to vector<16x128xf32>
    %8 = arith.subf %4, %7 : vector<16x128xf32>
    %9 = math.exp %8 : vector<16x128xf32>
    %cst_4 = arith.constant dense<0.000000e+00> : vector<16xf32>
    %10 = vector.multi_reduction <add>, %9, %cst_4 [1] : vector<16x128xf32> to vector<16xf32>
    %11 = vector.shape_cast %10 : vector<16xf32> to vector<16x1xf32>
    %12 = tpu.reciprocal %11 {approx = true} : vector<16x1xf32> -> vector<16x1xf32>
    %13 = vector.broadcast %12 : vector<16x1xf32> to vector<16x128xf32>
    %14 = arith.mulf %9, %13 : vector<16x128xf32>
    %c0_5 = arith.constant 0 : index
    %c0_6 = arith.constant 0 : index
    %15 = vector.load %arg3[%c0_5, %c0_6] : memref<16x256xf32, #tpu.memory_space<vmem>>, vector<16x128xf32>
    tpu.vector_store %arg3[%c0_5, %c0_6], %14 {strides = array<i32>} : memref<16x256xf32, #tpu.memory_space<vmem>>, vector<16x128xf32>,
    %16 = vector.extract_strided_slice %3 {offsets = [0, 128], sizes = [16, 128], strides = [1, 1]} : vector<16x256xf32> to vector<16x128xf32>
    %cst_7 = arith.constant dense<0xFF800000> : vector<16xf32>
    %17 = vector.multi_reduction <maximumf>, %16, %cst_7 [1] : vector<16x128xf32> to vector<16xf32>
    %18 = vector.shape_cast %17 : vector<16xf32> to vector<16x1xf32>
    %19 = vector.broadcast %18 : vector<16x1xf32> to vector<16x128xf32>
    %20 = arith.subf %16, %19 : vector<16x128xf32>
    %21 = math.exp %20 : vector<16x128xf32>
    %cst_8 = arith.constant dense<0.000000e+00> : vector<16xf32>
    %22 = vector.multi_reduction <add>, %21, %cst_8 [1] : vector<16x128xf32> to vector<16xf32>
    %23 = vector.shape_cast %22 : vector<16xf32> to vector<16x1xf32>
    %24 = tpu.reciprocal %23 {approx = true} : vector<16x1xf32> -> vector<16x1xf32>
    %25 = vector.broadcast %24 : vector<16x1xf32> to vector<16x128xf32>
    %26 = arith.mulf %21, %25 : vector<16x128xf32>
    %c0_9 = arith.constant 0 : index
    %c128 = arith.constant 128 : index
    %27 = vector.load %arg3[%c0_9, %c128] : memref<16x256xf32, #tpu.memory_space<vmem>>, vector<16x128xf32>
    tpu.vector_store %arg3[%c0_9, %c128], %26 {strides = array<i32>} : memref<16x256xf32, #tpu.memory_space<vmem>>, vector<16x128xf32>,
    return
  }
  func.func @transform_0(%arg0: i32) -> (i32, i32) {
    %c0_i32 = arith.constant 0 : i32
    %c0_i32_0 = arith.constant 0 : i32
    return %arg0, %c0_i32 : i32, i32
  }
  func.func @transform_1(%arg0: i32) -> (i32, i32) {
    %c0_i32 = arith.constant 0 : i32
    %c0_i32_0 = arith.constant 0 : i32
    %c0_i32_1 = arith.constant 0 : i32
    return %c0_i32, %c0_i32_0 : i32, i32
  }
  func.func @transform_2(%arg0: i32) -> (i32, i32) {
    %c0_i32 = arith.constant 0 : i32
    %c0_i32_0 = arith.constant 0 : i32
    return %arg0, %c0_i32 : i32, i32
  }
}

</mosaic_0001>

<bundles_post_ra>
// kernel: tpu_custom_call.1
= control target key start
LH: loop header
LB: loop body
LE: loop exit
PB: predicated region body
PF: predicated region fallthrough
CT: control target
= control target key end

     0   :  { %7 = vsyncpa [#allocation3], 0  ;;  %s339_s0 = inlined_call_operand.hbm [shape: f32[16,32], index: 0, kind: input, shape index: {}]   ;;  %s340_s1 = inlined_call_operand.hbm [shape: bf16[32,256], index: 1, kind: input, shape index: {}]   ;;  %s341_s2 = inlined_call_operand.hbm [shape: f32[16,256], index: 2, kind: output, shape index: {}]  }
   0x1   :  { %8 = vsyncpa [#allocation6], 0 }
   0x2   :  { %9 = vsyncpa [#allocation4], 0  ;;  %s280_s9 = smov [#allocation2]   ;;  %s208_s13 = scalar_lea.hbm %s339_s0, 256 }
   0x3   :  { %s15_s10 = sshll.u32 %s280_s9, 4  ;;  %p209_p0 = scmp.ne.s32.totalorder %s339_s0, %s208_s13  ;;  %s16_s10 = int_to_ptr.vmem [resolvable:$true] %s15_s10 }
   0x4   :  { %p212_p1 = scmp.lt.u32.totalorder %s208_s13, %s339_s0 }
   0x6   :  { %p214_p2 = pnand %p212_p1, %p209_p0 }
   0x8   :  { %217 = shalt.err (!%p214_p2)
}
   0x9   :  { %s218_s18 = scalar_lea.vmem %s16_s10, 256  ;;  %p223_p4 = scmp.lt.s32.totalorder %s16_s10, %s16_s10 }
   0xa   :  { %p219_p3 = scmp.ne.s32.totalorder %s16_s10, %s218_s18  ;;  %p224_p5 = scmp.lt.s32.totalorder %s218_s18, %s218_s18 }
   0xc   :  { %p225_p6 = por %p224_p5, %p223_p4 }
   0xe   :  { %p226_p7 = pnand %p225_p6, %p219_p3 }
  0x10   :  { %229 = shalt.err (!%p226_p7)
}
  0x11   :  { %s281_s19 = smov 128   ;;  %s282_s20 = smov 8  }
  0x12   :  { %21 = dma.hbm_to_vmem [thread:$0]  %s339_s0, 256, %s16_s10, [#allocation3], %s281_s19, %s281_s19, %s282_s20  }
  0x13   :  { %s283_s23 = smov [#allocation5]   ;;  %s230_s27 = scalar_lea.hbm %s340_s1, 512 }
  0x14   :  { %s27_s24 = sshll.u32 %s283_s23, 4  ;;  %p231_p8 = scmp.ne.s32.totalorder %s340_s1, %s230_s27  ;;  %s28_s24 = int_to_ptr.vmem [resolvable:$true] %s27_s24 }
  0x15   :  { %p234_p9 = scmp.lt.u32.totalorder %s230_s27, %s340_s1 }
  0x17   :  { %p236_p10 = pnand %p234_p9, %p231_p8 }
  0x19   :  { %239 = shalt.err (!%p236_p10)
}
  0x1a   :  { %s240_s4 = scalar_lea.vmem %s28_s24, 512  ;;  %p245_p12 = scmp.lt.s32.totalorder %s28_s24, %s28_s24 }
  0x1b   :  { %p241_p11 = scmp.ne.s32.totalorder %s28_s24, %s240_s4  ;;  %p246_p13 = scmp.lt.s32.totalorder %s240_s4, %s240_s4 }
  0x1d   :  { %p247_p0 = por %p246_p13, %p245_p12 }
  0x1f   :  { %p248_p1 = pnand %p247_p0, %p241_p11 }
  0x21   :  { %251 = shalt.err (!%p248_p1)
}
  0x22   :  { %33 = dma.hbm_to_vmem [thread:$0]  %s340_s1, 512, %s28_s24, [#allocation6], %s281_s19, %s281_s19, %s282_s20  }
  0x23   :  { %274 = dma.done.wait [#allocation3], 256  }
  0x24   :  { %275 = vsyncadd [#allocation3], 4294967040 }
  0x25   :  { %276 = dma.done.wait [#allocation6], 512  }
  0x26   :  { %277 = vsyncadd [#allocation6], 4294966784  ;;  %v284_v0 = vmov 0   ;;  %v186_v1 = vld [vmem:[#allocation5 + $0x4] ss:$8 sps:$4 sm:$0xff]   ;;  %v41_v5 = vld [vmem:[#allocation2] sm:$0xff] }
  0x27   :  { %104 = vmatprep.mubr.bf16.mxu0 %v284_v0  ;;  %v188_v2 = vld [vmem:[#allocation5] ss:$8 sps:$4 sm:$0xff]   ;;  %72 = vmatprep.subr.bf16.mxu0 %v186_v1  ;;  %v189_v3 = vld [vmem:[#allocation5 + $0x14] ss:$8 sps:$4 sm:$0xff]   ;;  %v191_v4 = vld [vmem:[#allocation5 + $0x10] ss:$8 sps:$4 sm:$0xff]  }
  0x28   :  { %73 = vmatpush1.bf16.msra.mxu0 %v188_v2  ;;  %v42_v6 = vld [vmem:[#allocation2 + $0x8] sm:$0xff]  ;;  %vm68_vm0 = vcmask 261120   ;;  %s285_s1 = smov [#allocation7]  }
  0x29   :  { %74 = vmatprep.subr.bf16.mxu0 %v189_v3  ;;  %v43_v7 = vpack.c.bf16 %v42_v6, %v41_v5  ;;  %s160_s6 = sshll.u32 %s285_s1, 4  ;;  %s161_s6 = int_to_ptr.vmem [resolvable:$true] %s160_s6 }
  0x2a   :  { %s252_s7 = scalar_lea.vmem %s161_s6, 512  ;;  %p257_p3 = scmp.lt.s32.totalorder %s161_s6, %s161_s6 }
  0x2b   :  { %p253_p2 = scmp.ne.s32.totalorder %s161_s6, %s252_s7  ;;  %p258_p4 = scmp.lt.s32.totalorder %s252_s7, %s252_s7 }
  0x2c   :  { %75 = vmatpush1.bf16.msra.mxu0 %v191_v4 }
  0x2d   :  { %p259_p5 = por %p258_p4, %p257_p3 }
  0x2f   :  { %177 = vmatmul.mubr.msk.bf16.vlgmr.msra.gmra.mrb[0].mxu0 %vm68_vm0, %v43_v7  ;;  %p260_p6 = pnand %p259_p5, %p253_p2 }
 0x102   :  { %v106_v8 = vpop.f32.mrb[0].mxu0 }
 0x103   :  { %115 = vmax.xlane.f32.xlu0 %v106_v8  ;;  %v108_v9 = vpop.f32.mrb[1].mxu0 }
 0x104   :  { %135 = vmax.xlane.f32.xlu1 %v108_v9  ;;  %v110_v10 = vpop.f32.mrb[2].mxu0 }
 0x105   :  { %v112_v11 = vpop.f32.mrb[3].mxu0 }
 0x107   :  { %117 = vmax.xlane.f32.xlu0 %v110_v10 }
 0x108   :  { %137 = vmax.xlane.f32.xlu1 %v112_v11 }
 0x190   :  { %v116_v12 = vpop.xlane.xlu0 %115 }
 0x191   :  { %v119_v13 = vsub.f32 %v106_v8, %v116_v12  ;;  %v136_v14 = vpop.xlane.xlu1 %135 }
 0x192   :  { %v139_v15 = vsub.f32 %v108_v9, %v136_v14 }
 0x193   :  { %v121_v16 = vmul.f32 1.442695, %v119_v13 }
 0x194   :  { %v141_v17 = vmul.f32 1.442695, %v139_v15  ;;  %v118_v18 = vpop.xlane.xlu0 %117 }
 0x195   :  { %192 = vpow2.f32 %v121_v16  ;;  %v120_v19 = vsub.f32 %v110_v10, %v118_v18  ;;  %v138_v20 = vpop.xlane.xlu1 %137 }
 0x196   :  { %v140_v21 = vsub.f32 %v112_v11, %v138_v20  ;;  %194 = vpow2.f32 %v141_v17 }
 0x197   :  { %v123_v22 = vmul.f32 1.442695, %v120_v19 }
 0x198   :  { %v143_v23 = vmul.f32 1.442695, %v140_v21 }
 0x199   :  { %196 = vpow2.f32 %v123_v22 }
 0x19a   :  { %198 = vpow2.f32 %v143_v23 }
 0x19f   :  { %v193_v24 = vpop.eup %192 }
 0x1a0   :  { %125 = vadd.xlane.f32.xlu0 %v193_v24  ;;  %v195_v25 = vpop.eup %194 }
 0x1a3   :  { %v197_v26 = vpop.eup %196 }
 0x1a4   :  { %145 = vadd.xlane.f32.xlu0 %v195_v25  ;;  %127 = vadd.xlane.f32.xlu1 %v197_v26  ;;  %v199_v27 = vpop.eup %198 }
 0x1a8   :  { %147 = vadd.xlane.f32.xlu1 %v199_v27 }
 0x22d   :  { %v126_v28 = vpop.xlane.xlu0 %125 }
 0x22e   :  { %200 = vrcp.f32 %v126_v28 }
 0x231   :  { %v146_v29 = vpop.xlane.xlu0 %145  ;;  %v128_v30 = vpop.xlane.xlu1 %127 }
 0x232   :  { %202 = vrcp.f32 %v146_v29 }
 0x233   :  { %204 = vrcp.f32 %v128_v30 }
 0x235   :  { %v148_v31 = vpop.xlane.xlu1 %147 }
 0x236   :  { %206 = vrcp.f32 %v148_v31 }
 0x238   :  { %v201_v32 = vpop.eup %200 }
 0x239   :  { %v131_v33 = vmul.f32 %v201_v32, %v193_v24 }
 0x23b   :  { %133 = vst [vmem:[#allocation7] sm:$0xff] %v131_v33 }
 0x23c   :  { %v203_v34 = vpop.eup %202 }
 0x23d   :  { %v205_v35 = vpop.eup %204  ;;  %v151_v36 = vmul.f32 %v203_v34, %v195_v25 }
 0x23e   :  { %v132_v37 = vmul.f32 %v205_v35, %v197_v26 }
 0x23f   :  { %153 = vst [vmem:[#allocation7 + $0x8] sm:$0xff] %v151_v36 }
 0x240   :  { %v207_v38 = vpop.eup %206  ;;  %134 = vst [vmem:[#allocation7 + $0x10] sm:$0xff] %v132_v37 }
 0x241   :  { %v152_v39 = vmul.f32 %v207_v38, %v199_v27 }
 0x243   :  { %154 = vst [vmem:[#allocation7 + $0x18] sm:$0xff] %v152_v39 }
 0x244   :  { %263 = shalt.err (!%p260_p6)
}
 0x245   :  { %s264_s10 = scalar_lea.hbm %s341_s2, 512 }
 0x246   :  { %p265_p7 = scmp.ne.s32.totalorder %s341_s2, %s264_s10  ;;  %p268_p8 = scmp.lt.u32.totalorder %s264_s10, %s341_s2 }
 0x248   :  { %p270_p9 = pnand %p268_p8, %p265_p7 }
 0x24a   :  { %273 = shalt.err (!%p270_p9)
}
 0x24b   :  { %s286_s15 = smov 256   ;;  %s287_s16 = smov 16  }
 0x24c   :  { %166 = dma.vmem_to_hbm [thread:$0]  %s161_s6, 512, %s341_s2, [#allocation4], %s286_s15, %s286_s15, %s287_s16  }
 0x24d   :  { %278 = dma.done.wait [#allocation4], 512  }
 0x24e   :  { %279 = vsyncadd [#allocation4], 4294966784 }
 0x24f   :  { %170 = vsyncpa [#allocation3], 1 }
 0x250   :  { %171 = vsyncpa [#allocation6], 1 }
 0x251   :  { %172 = vsyncpa [#allocation4], 1 }

</bundles_post_ra>
